<compile_context>
chip_gen: v6e
topology: v6e:2x2x1
jax: 0.10.0
libtpu: 0.0.40
codegen_flags: <defaults>
</compile_context>

<pallas_src>
import math

import jax
import jax.numpy as jnp
from jax import lax
from jax.experimental import pallas as pl
from jax.experimental.pallas import tpu as pltpu


def _rope_kernel(x_ref, cs_ref, o_ref):
    """x_ref/o_ref: (1, tn, d) tiles; cs_ref: (tn, d) tile, reused across the reps axis.

    cs holds interleaved angles: lane 2i = cos(theta_i), lane 2i+1 = sin(theta_i).
      out[2i]   = x[2i]*cos_i - x[2i+1]*sin_i
      out[2i+1] = x[2i]*sin_i + x[2i+1]*cos_i
    """
    x = x_ref[0]          # (tn, d)
    cs = cs_ref[...]      # (tn, d)
    d = x.shape[-1]

    lane = lax.broadcasted_iota(jnp.int32, x.shape, 1)
    is_even = (lane & 1) == 0

    # Circular lane rolls (XLU); the wrap-around lanes are never selected
    # (lane 0 is even, lane d-1 is odd), so the wrapped values don't matter.
    cs_prev = pltpu.roll(cs, shift=1, axis=1)      # lane j -> cs[j-1]
    cs_next = pltpu.roll(cs, shift=d - 1, axis=1)  # lane j -> cs[j+1]
    x_prev = pltpu.roll(x, shift=1, axis=1)
    x_next = pltpu.roll(x, shift=d - 1, axis=1)

    c = jnp.where(is_even, cs, cs_prev)            # cos_i on both lanes of the pair
    s = jnp.where(is_even, cs_next, cs)            # sin_i on both lanes of the pair
    partner = jnp.where(is_even, -x_next, x_prev)  # -x[2i+1] on even lanes, x[2i] on odd

    o_ref[0] = (x * c + partner * s).astype(o_ref.dtype)


def _round_up(a: int, b: int) -> int:
    return -(-a // b) * b


def _cdiv(a: int, b: int) -> int:
    return -(-a // b)


class RotaryPositionalEmbedding:
    """JAX/Pallas port of the PyTorch RotaryPositionalEmbedding module."""

    def __init__(self, theta: float, d_k: int, max_seq_len: int):
        assert d_k % 2 == 0
        positions = jnp.arange(max_seq_len, dtype=jnp.float32)[:, None]   # (L, 1)
        freqs = jnp.arange(0, d_k, 2, dtype=jnp.float32) / d_k            # (d_k/2,)
        inv_freqs = 1.0 / (theta ** freqs)
        angles = positions * inv_freqs                                    # (L, d_k/2)
        # Interleaved table: lane 2i = cos_i, lane 2i+1 = sin_i -> a single side stream.
        self.cs_table = jnp.stack(
            [jnp.cos(angles), jnp.sin(angles)], axis=-1
        ).reshape(max_seq_len, d_k)
        self.cos = jnp.cos(angles)   # kept for reference checking / inspection
        self.sin = jnp.sin(angles)
        self.d_k = d_k

    def __call__(self, x: jax.Array, token_positions: jax.Array) -> jax.Array:
        d_k = self.d_k
        assert x.shape[-1] == d_k
        lead = tuple(x.shape[:-1])
        pshape = tuple(token_positions.shape)

        # PyTorch-style right-aligned broadcasting of cos[token_positions] with x[..., ::2].
        out_lead = jnp.broadcast_shapes(lead, pshape)
        if out_lead != lead:                      # rare: x itself broadcasts up
            x = jnp.broadcast_to(x, out_lead + (d_k,))
            lead = out_lead

        # Squeeze leading singleton axes of the positions so the remaining axes
        # right-align with a *suffix* of `lead`; everything in front of that suffix is a
        # pure repetition ("reps") axis over which the cos/sin rows can be reused.
        p = pshape
        while p and p[0] == 1:
            p = p[1:]
        pos = token_positions.reshape(p)
        k = len(p)
        prefix = lead[: len(lead) - k]
        suffix = lead[len(lead) - k:] if k else ()
        reps = math.prod(prefix) if prefix else 1
        m = math.prod(suffix) if suffix else 1

        # Gather only the m distinct position rows (not reps*m rows) in the wrapper.
        pos_flat = jnp.broadcast_to(pos, suffix).reshape((m,)).astype(jnp.int32)
        csf = self.cs_table[pos_flat].astype(x.dtype)                     # (m, d_k)

        # Lane packing: fold several heads into one 128-lane row when d_k < 128 so the
        # output stores stay lane-dense. The parity/roll math is fold-boundary safe.
        d = d_k
        if d_k < 128 and 128 % d_k == 0:
            fold = 128 // d_k
            if m % fold == 0 and m >= fold:
                m //= fold
                d = d_k * fold
        csf = csf.reshape(m, d)
        xf = x.reshape(reps, m, d)

        # Tile size: as large as fits comfortably in VMEM (x/cs/out, double-buffered).
        # No padding: the partial last block is masked by Pallas.
        itemsize = jnp.dtype(x.dtype).itemsize
        vmem_per_row = 2 * 3 * d * itemsize                  # 3 streams, double-buffered
        tn = min(4096, (12 * 1024 * 1024) // vmem_per_row)
        tn = max(8, (tn // 8) * 8)
        tn = min(tn, _round_up(m, 8))
        # Keep >= 8 grid steps (when there is enough work) so v7x's two TensorCores
        # both get a share of the "parallel" axis.
        while tn > 256 and _cdiv(m, tn) * reps < 8:
            tn //= 2
        tn = max(8, (tn // 8) * 8)

        grid = (_cdiv(m, tn), reps)   # reps is the innermost axis -> cs tile is reused

        out = pl.pallas_call(
            _rope_kernel,
            out_shape=jax.ShapeDtypeStruct((reps, m, d), x.dtype),
            grid=grid,
            in_specs=[
                pl.BlockSpec((1, tn, d), lambda i, r: (r, i, 0)),
                # cs index_map ignores the reps axis -> fetched once per row tile and
                # kept resident in VMEM while all reps steps consume it.
                pl.BlockSpec((tn, d), lambda i, r: (i, 0)),
            ],
            out_specs=pl.BlockSpec((1, tn, d), lambda i, r: (r, i, 0)),
            compiler_params=pltpu.CompilerParams(
                dimension_semantics=("parallel", "arbitrary"),
                vmem_limit_bytes=32 * 1024 * 1024),
        )(xf, csf)

        return out.reshape(*lead, d_k)


if __name__ == "__main__":
    theta, d_k, max_seq_len = 10000.0, 128, 32
    rope = RotaryPositionalEmbedding(theta, d_k, max_seq_len)

    def reference(x, token_positions):
        # Pure-JAX reference mirroring the PyTorch forward exactly.
        cos_pos = rope.cos[token_positions]
        sin_pos = rope.sin[token_positions]
        x_even = x[..., 0::2]
        x_odd = x[..., 1::2]
        re = x_even * cos_pos - x_odd * sin_pos
        ro = x_even * sin_pos + x_odd * cos_pos
        return jnp.stack([re, ro], axis=-1).reshape(x.shape)

    key = jax.random.PRNGKey(0)
    k1, k2, k3 = jax.random.split(key, 3)

    # Case 1: per-(batch, seq) positions, x (B, S, d_k) -> no reuse axis (reps = 1).
    B, S = 2, 8
    x = jax.random.normal(k1, (B, S, d_k), dtype=jnp.float32)
    token_positions = jax.random.randint(k2, (B, S), 0, max_seq_len, dtype=jnp.int32)
    out = jax.block_until_ready(rope(x, token_positions))
    assert out.shape == x.shape and out.dtype == x.dtype
    assert jnp.allclose(out, reference(x, token_positions), atol=1e-5, rtol=1e-5), \
        "mismatch vs reference (case 1)"

    # Case 2: shared positions broadcast over (batch, heads) -> exercises the cs-reuse
    # (2-D grid, reps axis) path.
    B, H, S = 2, 3, 8
    x2 = jax.random.normal(k3, (B, H, S, d_k), dtype=jnp.float32)
    pos2 = jnp.arange(S, dtype=jnp.int32)
    out2 = jax.block_until_ready(rope(x2, pos2))
    assert out2.shape == x2.shape and out2.dtype == x2.dtype
    assert jnp.allclose(out2, reference(x2, pos2), atol=1e-5, rtol=1e-5), \
        "mismatch vs reference (case 2)"

    print("KERNEL_OK")
</pallas_src>

<mosaic_0001>
module attributes {stable_mosaic.version = 11 : i64} {
  func.func @_rope_kernel(%arg0: i32, %arg1: i32, %arg2: memref<1x16x128xf32, #tpu.memory_space<vmem>>, %arg3: memref<16x128xf32, #tpu.memory_space<vmem>>, %arg4: memref<1x16x128xf32, #tpu.memory_space<vmem>>) attributes {dimension_semantics = [#tpu.dimension_semantics<parallel>, #tpu.dimension_semantics<arbitrary>], iteration_bounds = array<i64: 1, 1>, scalar_prefetch = 0 : i64, scratch_operands = 0 : i64, tpu.core_type = #tpu.core_type<tc>, window_params = [{transform_indices = @transform_0, window_bounds = array<i64: 1, 16, 128>}, {transform_indices = @transform_1, window_bounds = array<i64: 16, 128>}, {transform_indices = @transform_2, window_bounds = array<i64: 1, 16, 128>}]} {
    %c0 = arith.constant 0 : index
    %c0_0 = arith.constant 0 : index
    %c0_1 = arith.constant 0 : index
    %0 = vector.load %arg2[%c0, %c0_0, %c0_1] : memref<1x16x128xf32, #tpu.memory_space<vmem>>, vector<1x16x128xf32>
    %1 = vector.shape_cast %0 : vector<1x16x128xf32> to vector<16x128xf32>
    %c0_2 = arith.constant 0 : index
    %c0_3 = arith.constant 0 : index
    %2 = vector.load %arg3[%c0_2, %c0_3] : memref<16x128xf32, #tpu.memory_space<vmem>>, vector<16x128xf32>
    %3 = tpu.iota {dimensions = array<i32: 1>} : vector<16x128xi32>
    %c1_i32 = arith.constant 1 : i32
    %4 = vector.broadcast %c1_i32 : i32 to vector<16x128xi32>
    %5 = arith.andi %3, %4 : vector<16x128xi32>
    %c0_i32 = arith.constant 0 : i32
    %6 = vector.broadcast %c0_i32 : i32 to vector<16x128xi32>
    %7 = arith.cmpi eq, %5, %6 : vector<16x128xi32>
    %c1_i32_4 = arith.constant 1 : i32
    %8 = tpu.dynamic_rotate %2 by %c1_i32_4 dim 1 : vector<16x128xf32>, i32 -> vector<16x128xf32>
    %c127_i32 = arith.constant 127 : i32
    %9 = tpu.dynamic_rotate %2 by %c127_i32 dim 1 : vector<16x128xf32>, i32 -> vector<16x128xf32>
    %c1_i32_5 = arith.constant 1 : i32
    %10 = tpu.dynamic_rotate %1 by %c1_i32_5 dim 1 : vector<16x128xf32>, i32 -> vector<16x128xf32>
    %c127_i32_6 = arith.constant 127 : i32
    %11 = tpu.dynamic_rotate %1 by %c127_i32_6 dim 1 : vector<16x128xf32>, i32 -> vector<16x128xf32>
    %12 = arith.select %7, %2, %8 : vector<16x128xi1>, vector<16x128xf32>
    %13 = arith.select %7, %9, %2 : vector<16x128xi1>, vector<16x128xf32>
    %cst = arith.constant 0.000000e+00 : f32
    %14 = vector.broadcast %cst : f32 to vector<16x128xf32>
    %15 = arith.subf %14, %11 : vector<16x128xf32>
    %16 = arith.select %7, %15, %10 : vector<16x128xi1>, vector<16x128xf32>
    %17 = arith.mulf %1, %12 : vector<16x128xf32>
    %18 = arith.mulf %16, %13 : vector<16x128xf32>
    %19 = arith.addf %17, %18 : vector<16x128xf32>
    %c0_7 = arith.constant 0 : index
    %c0_8 = arith.constant 0 : index
    %c0_9 = arith.constant 0 : index
    %20 = vector.load %arg4[%c0_7, %c0_8, %c0_9] : memref<1x16x128xf32, #tpu.memory_space<vmem>>, vector<1x16x128xf32>
    %21 = vector.shape_cast %20 : vector<1x16x128xf32> to vector<16x128xf32>
    %22 = vector.shape_cast %19 : vector<16x128xf32> to vector<1x16x128xf32>
    tpu.vector_store %arg4[%c0_7, %c0_8, %c0_9], %22 {strides = array<i32>} : memref<1x16x128xf32, #tpu.memory_space<vmem>>, vector<1x16x128xf32>,
    return
  }
  func.func @transform_0(%arg0: i32, %arg1: i32) -> (i32, i32, i32) {
    %c0_i32 = arith.constant 0 : i32
    %c0_i32_0 = arith.constant 0 : i32
    return %arg1, %arg0, %c0_i32 : i32, i32, i32
  }
  func.func @transform_1(%arg0: i32, %arg1: i32) -> (i32, i32) {
    %c0_i32 = arith.constant 0 : i32
    %c0_i32_0 = arith.constant 0 : i32
    return %arg0, %c0_i32 : i32, i32
  }
  func.func @transform_2(%arg0: i32, %arg1: i32) -> (i32, i32, i32) {
    %c0_i32 = arith.constant 0 : i32
    %c0_i32_0 = arith.constant 0 : i32
    return %arg1, %arg0, %c0_i32 : i32, i32, i32
  }
}

</mosaic_0001>

<bundles_post_ra>
// kernel: tpu_custom_call.1
= control target key start
LH: loop header
LB: loop body
LE: loop exit
PB: predicated region body
PF: predicated region fallthrough
CT: control target
= control target key end

     0   :  { %7 = vsyncpa [#allocation3], 0  ;;  %s227_s0 = inlined_call_operand.hbm [shape: f32[1,16,128], index: 0, kind: input, shape index: {}]   ;;  %s228_s1 = inlined_call_operand.hbm [shape: f32[16,128], index: 1, kind: input, shape index: {}]   ;;  %s229_s2 = inlined_call_operand.hbm [shape: f32[1,16,128], index: 2, kind: output, shape index: {}]  }
   0x1   :  { %8 = vsyncpa [#allocation6], 0 }
   0x2   :  { %9 = vsyncpa [#allocation4], 0  ;;  %s171_s9 = smov [#allocation2]  }
   0x3   :  { %s15_s10 = sshll.u32 %s171_s9, 4  ;;  %s16_s10 = int_to_ptr.vmem [resolvable:$true] %s15_s10 }
   0x4   :  { %s113_s11 = scalar_lea.vmem %s16_s10, 256  ;;  %p118_p1 = scmp.lt.s32.totalorder %s16_s10, %s16_s10 }
   0x5   :  { %p114_p0 = scmp.ne.s32.totalorder %s16_s10, %s113_s11  ;;  %p119_p2 = scmp.lt.s32.totalorder %s113_s11, %s113_s11 }
   0x7   :  { %p120_p3 = por %p119_p2, %p118_p1 }
   0x9   :  { %p121_p4 = pnand %p120_p3, %p114_p0 }
   0xb   :  { %124 = shalt.err (!%p121_p4)
}
   0xc   :  { %s172_s12 = smov 128   ;;  %s173_s13 = smov 8  }
   0xd   :  { %21 = dma.hbm_to_vmem [thread:$0]  %s227_s0, 256, %s16_s10, [#allocation3], %s172_s12, %s172_s12, %s173_s13  }
   0xe   :  { %s174_s16 = smov [#allocation5]  }
   0xf   :  { %s27_s17 = sshll.u32 %s174_s16, 4  ;;  %s28_s17 = int_to_ptr.vmem [resolvable:$true] %s27_s17 }
  0x10   :  { %s133_s18 = scalar_lea.vmem %s28_s17, 256  ;;  %p138_p6 = scmp.lt.s32.totalorder %s28_s17, %s28_s17 }
  0x11   :  { %p134_p5 = scmp.ne.s32.totalorder %s28_s17, %s133_s18  ;;  %p139_p7 = scmp.lt.s32.totalorder %s133_s18, %s133_s18 }
  0x13   :  { %p140_p8 = por %p139_p7, %p138_p6 }
  0x15   :  { %p141_p9 = pnand %p140_p8, %p134_p5 }
  0x17   :  { %144 = shalt.err (!%p141_p9)
}
  0x18   :  { %33 = dma.hbm_to_vmem [thread:$0]  %s228_s1, 256, %s28_s17, [#allocation6], %s172_s12, %s172_s12, %s173_s13  }
  0x19   :  { %165 = dma.done.wait [#allocation3], 256  }
  0x1a   :  { %166 = vsyncadd [#allocation3], 4294967040 }
  0x1b   :  { %167 = dma.done.wait [#allocation6], 256  }
  0x1c   :  { %168 = vsyncadd [#allocation6], 4294967040  ;;  %v42_v0 = vld [vmem:[#allocation5] sm:$0xff]  ;;  %v40_v1 = vld [vmem:[#allocation2] sm:$0xff]  ;;  %s175_s0 = smov 1   ;;  %s176_s21 = smov 127   ;;  %v44_v4 = vlaneseq }
  0x1d   :  { %48 = vrot.lane.b32.xlu1 %v42_v0, %s175_s0  ;;  %60 = vrot.lane.b32.xlu0 %v40_v1, %s176_s21  ;;  %v43_v2 = vld [vmem:[#allocation5 + $0x8] sm:$0xff]  ;;  %v41_v3 = vld [vmem:[#allocation2 + $0x8] sm:$0xff]  ;;  %s177_s1 = smov [#allocation7]  }
  0x1e   :  { %v45_v5 = vand.u32 127, %v44_v4  ;;  %s85_s22 = sshll.u32 %s177_s1, 4  ;;  %s86_s22 = int_to_ptr.vmem [resolvable:$true] %s85_s22 }
  0x1f   :  { %s145_s23 = scalar_lea.vmem %s86_s22, 256  ;;  %p150_p11 = scmp.lt.s32.totalorder %s86_s22, %s86_s22 }
  0x20   :  { %v46_v8 = vand.u32 1, %v45_v5  ;;  %p146_p10 = scmp.ne.s32.totalorder %s86_s22, %s145_s23  ;;  %p151_p12 = scmp.lt.s32.totalorder %s145_s23, %s145_s23 }
  0x21   :  { %50 = vrot.lane.b32.xlu1 %v43_v2, %s175_s0  ;;  %62 = vrot.lane.b32.xlu0 %v41_v3, %s176_s21 }
  0x22   :  { %vm205_vm0 = vcmp.eq.s32.totalorder %v46_v8, 0  ;;  %p152_p13 = por %p151_p12, %p150_p11 }
  0x24   :  { %p153_p0 = pnand %p152_p13, %p146_p10 }
  0x25   :  { %54 = vrot.lane.b32.xlu1 %v43_v2, %s176_s21  ;;  %52 = vrot.lane.b32.xlu0 %v42_v0, %s176_s21 }
  0x29   :  { %58 = vrot.lane.b32.xlu1 %v41_v3, %s175_s0  ;;  %56 = vrot.lane.b32.xlu0 %v40_v1, %s175_s0 }
  0x8f   :  { %v49_v6 = vpop.permute.xlu1 %48  ;;  %v61_v7 = vpop.permute.xlu0 %60 }
  0x90   :  { %v64_v14 = vsel %vm205_vm0, %v42_v0, %v49_v6  ;;  %v68_v15 = vsub.f32 0.0, %v61_v7 }
  0x91   :  { %v72_v24 = vmul.f32 %v64_v14, %v40_v1 }
  0x93   :  { %v51_v9 = vpop.permute.xlu1 %50  ;;  %v63_v10 = vpop.permute.xlu0 %62 }
  0x94   :  { %v65_v16 = vsel %vm205_vm0, %v43_v2, %v51_v9  ;;  %v69_v17 = vsub.f32 0.0, %v63_v10 }
  0x95   :  { %v73_v25 = vmul.f32 %v65_v16, %v41_v3 }
  0x97   :  { %v55_v12 = vpop.permute.xlu1 %54  ;;  %v53_v13 = vpop.permute.xlu0 %52 }
  0x98   :  { %v67_v20 = vsel %vm205_vm0, %v55_v12, %v43_v2  ;;  %v66_v21 = vsel %vm205_vm0, %v53_v13, %v42_v0 }
  0x9b   :  { %v59_v18 = vpop.permute.xlu1 %58  ;;  %v57_v19 = vpop.permute.xlu0 %56 }
  0x9c   :  { %v71_v22 = vsel %vm205_vm0, %v69_v17, %v59_v18  ;;  %v70_v23 = vsel %vm205_vm0, %v68_v15, %v57_v19 }
  0x9d   :  { %v75_v26 = vmul.f32 %v71_v22, %v67_v20  ;;  %v74_v27 = vmul.f32 %v70_v23, %v66_v21 }
  0x9f   :  { %v77_v28 = vadd.f32 %v75_v26, %v73_v25  ;;  %v76_v29 = vadd.f32 %v74_v27, %v72_v24 }
  0xa1   :  { %79 = vst [vmem:[#allocation7 + $0x8] sm:$0xff] %v77_v28  ;;  %78 = vst [vmem:[#allocation7] sm:$0xff] %v76_v29 }
  0xa2   :  { %156 = shalt.err (!%p153_p0)
}
  0xa3   :  { %91 = dma.vmem_to_hbm [thread:$0]  %s86_s22, 256, %s229_s2, [#allocation4], %s172_s12, %s172_s12, %s173_s13  }
  0xa4   :  { %169 = dma.done.wait [#allocation4], 256  }
  0xa5   :  { %170 = vsyncadd [#allocation4], 4294967040 }
  0xa6   :  { %95 = vsyncpa [#allocation3], 1 }
  0xa7   :  { %96 = vsyncpa [#allocation6], 1 }
  0xa8   :  { %97 = vsyncpa [#allocation4], 1 }

</bundles_post_ra>
